<compile_context>
chip_gen: v5e
topology: v5e:2x2
jax: 0.10.0
libtpu: 0.0.40
codegen_flags: <defaults>
</compile_context>

<pallas_src>
import functools

import jax
import jax.numpy as jnp
from jax.experimental import pallas as pl
from jax.experimental.pallas import tpu as pltpu

LANE = 128  # lane width of a TPU vreg (last dim)


def _round_up(x, m):
    return (x + m - 1) // m * m


def _device_kind():
    try:
        return jax.devices()[0].device_kind.lower()
    except Exception:
        return ""


def _is_v7x():
    return "v7" in _device_kind()


def _default_batch_tile():
    # ~512-row tiles reach ~85% of HBM roofline on v5e/v6e; 256 on v7x (64 MiB VMEM, 2 TC).
    return 256 if _is_v7x() else 512


# ----------------------------------------------------------------------------- kernel
def annnet_kernel(x_ref, w1_ref, b1_ref, w2_ref, b2_ref, w3_ref, b3_ref, o_ref):
    cdt = w1_ref.dtype                     # bf16 MXU operand dtype
    tb = x_ref.shape[0]
    hid_p = w2_ref.shape[1]

    # x arrives f32 (unpadded d_in lanes in HBM); cast once in-kernel, no extra XLA op.
    x = x_ref[...].astype(cdt)
    w1 = w1_ref[...]
    w2 = w2_ref[...]
    w3 = w3_ref[...]
    b1 = b1_ref[...]                        # f32 biases add into the f32 accumulator
    b3 = b3_ref[...]
    # Hoist the b2 broadcast out of the unrolled x3 loop (JAX does not CSE broadcast_in_dim).
    b2b = jnp.broadcast_to(b2_ref[...], (tb, hid_p))

    # fc1 + ReLU (f32 accumulation on the MXU)
    h = jnp.dot(x, w1, preferred_element_type=jnp.float32) + b1
    h = jnp.maximum(h, 0.0)

    # fc2 applied THREE times with the SAME weights (as in the module), ReLU each time.
    for _ in range(3):
        h = jnp.dot(h.astype(cdt), w2, preferred_element_type=jnp.float32) + b2b
        h = jnp.maximum(h, 0.0)

    # fc3 (no activation); single lane-dense (128-padded) store.
    out = jnp.dot(h.astype(cdt), w3, preferred_element_type=jnp.float32) + b3
    o_ref[...] = out.astype(o_ref.dtype)


# ----------------------------------------------------------------------------- params
def prepare_params(params, compute_dtype=jnp.bfloat16):
    """Transpose once to [in, out], zero-pad OUTPUT/lane dims to 128, cast weights to bf16.

    x's feature dim (d_in) is intentionally NOT padded: the kernel's x block uses the full
    d_in as its last dim (legal), so the x HBM stream is not inflated 8x.
    Biases stay f32 (they add into the f32 accumulator). Zero padding is exact for this
    network: padded hidden units stay 0 through ReLU and padded output columns are sliced off.
    """
    w1, b1, w2, b2, w3, b3 = params  # PyTorch convention: W [out, in], b [1, out]

    d_in, hid, d_out = w1.shape[1], w1.shape[0], w3.shape[0]
    hid_p = _round_up(hid, LANE)     # 128 is the right floor; do NOT inflate to 256
    d_out_p = _round_up(d_out, LANE)

    def pad2(a, rows, cols):
        return jnp.pad(a, ((0, rows - a.shape[0]), (0, cols - a.shape[1])))

    w1t = pad2(w1.T, d_in, hid_p).astype(compute_dtype)      # [d_in, hid_p]
    w2t = pad2(w2.T, hid_p, hid_p).astype(compute_dtype)      # [hid_p, hid_p]
    w3t = pad2(w3.T, hid_p, d_out_p).astype(compute_dtype)    # [hid_p, d_out_p]
    b1p = pad2(b1, 1, hid_p).astype(jnp.float32)
    b2p = pad2(b2, 1, hid_p).astype(jnp.float32)
    b3p = pad2(b3, 1, d_out_p).astype(jnp.float32)

    return (w1t, b1p, w2t, b2p, w3t, b3p)


# ----------------------------------------------------------------------------- forward
@functools.partial(jax.jit, static_argnames=("d_out",))
def annnet_forward(x, h, params, *, d_out):
    """ANNNet forward as one Pallas call. `h` is unused (matches the module).

    The batch pad, the pallas_call, and the final un-pad slice all live in this single jit.
    """
    del h  # unused, same as the PyTorch forward

    w1t, b1, w2t, b2, w3t, b3 = params
    d_in = w1t.shape[0]
    hid_p = w2t.shape[1]
    d_out_p = w3t.shape[1]
    cdt = w1t.dtype
    sub = 16 if cdt == jnp.bfloat16 else 8     # bf16 packs 16 rows per sublane group

    batch = x.shape[0]
    tb_target = _default_batch_tile()
    batch_p = _round_up(batch, sub)
    tb = min(tb_target, batch_p)
    batch_p = _round_up(batch_p, tb)
    grid = batch_p // tb

    # Batch pad only; NO feature/lane padding of x in HBM.
    xp = jnp.pad(x, ((0, batch_p - batch), (0, 0))).astype(jnp.float32)

    # Explicit VMEM accounting: resident weights/biases (double-buffered once each at step 0)
    # + pipelined x blocks + double-buffered out blocks, plus generous headroom. Capped so it
    # is safe even on v7x (64 MiB physical / 32 MiB default scoped).
    n_x_buf = 3 if _is_v7x() else 2
    weight_bytes = sum(a.size * a.dtype.itemsize for a in (w1t, b1, w2t, b2, w3t, b3))
    x_block_bytes = tb * d_in * 4
    out_block_bytes = tb * d_out_p * 4
    per_call_bytes = 2 * weight_bytes + n_x_buf * x_block_bytes + 2 * out_block_bytes
    vmem_budget = int(min(48 << 20, max(8 << 20, 4 * per_call_bytes)))

    # Advisory cost hint for the surrounding XLA scheduler.
    flops = 2 * batch_p * (d_in * hid_p + 3 * hid_p * hid_p + hid_p * d_out_p)
    bytes_accessed = (
        xp.size * xp.dtype.itemsize + weight_bytes + batch_p * d_out_p * 4
    )

    if _is_v7x():
        # Extra x buffer to hide per-step DMA latency behind 3.2 TB/s HBM (cheap: 16 lanes).
        x_spec = pl.BlockSpec((tb, d_in), lambda i: (i, 0), pipeline_mode=pl.Buffered(3))
    else:
        x_spec = pl.BlockSpec((tb, d_in), lambda i: (i, 0))

    def const_spec(shape):
        return pl.BlockSpec(shape, lambda i: (0, 0))

    out_p = pl.pallas_call(
        annnet_kernel,
        out_shape=jax.ShapeDtypeStruct((batch_p, d_out_p), jnp.float32),
        grid=(grid,),
        in_specs=[
            x_spec,
            const_spec(w1t.shape), const_spec(b1.shape),
            const_spec(w2t.shape), const_spec(b2.shape),
            const_spec(w3t.shape), const_spec(b3.shape),
        ],
        out_specs=pl.BlockSpec((tb, d_out_p), lambda i: (i, 0)),
        cost_estimate=pl.CostEstimate(
            flops=flops, transcendentals=0, bytes_accessed=bytes_accessed
        ),
        compiler_params=pltpu.CompilerParams(
            dimension_semantics=("parallel",),   # megacore sharding on v7x; harmless elsewhere
            vmem_limit_bytes=vmem_budget,
        ),
    )(xp, w1t, b1, w2t, b2, w3t, b3)

    # Padded batch rows carry relu(b1)-derived junk and padded output columns are zero;
    # slice both off INSIDE this jit so callers only ever see the logical result.
    return out_p[:batch, :d_out]


# ----------------------------------------------------------------------------- init
def init_params(key, input_dim, hidden_dim, output_dim):
    """Deterministic init mimicking nn.Linear shapes: W [out, in], b [1, out]."""
    ks = jax.random.split(key, 6)

    def linear(kw, kb, fan_in, fan_out):
        bound = 1.0 / (fan_in ** 0.5)
        w = jax.random.uniform(kw, (fan_out, fan_in), jnp.float32, -bound, bound)
        b = jax.random.uniform(kb, (1, fan_out), jnp.float32, -bound, bound)
        return w, b

    w1, b1 = linear(ks[0], ks[1], input_dim, hidden_dim)
    w2, b2 = linear(ks[2], ks[3], hidden_dim, hidden_dim)
    w3, b3 = linear(ks[4], ks[5], hidden_dim, output_dim)
    return (w1, b1, w2, b2, w3, b3)


if __name__ == "__main__":
    input_dim, hidden_dim, output_dim = 16, 32, 8
    batch = 4

    key = jax.random.PRNGKey(0)
    kx, kh, kp = jax.random.split(key, 3)

    x = jax.random.normal(kx, (batch, input_dim), jnp.float32)
    h = jax.random.normal(kh, (batch, hidden_dim), jnp.float32)  # unused, like the module
    params = init_params(kp, input_dim, hidden_dim, output_dim)

    prepared = prepare_params(params)  # transpose / pad / cast ONCE (bf16 operands everywhere)

    out = annnet_forward(x, h, prepared, d_out=output_dim)
    jax.block_until_ready(out)
    assert out.shape == (batch, output_dim)

    # Pure-JAX f32 reference (PyTorch [out, in] convention)
    w1, b1, w2, b2, w3, b3 = params
    ref = jnp.maximum(x @ w1.T + b1, 0.0)
    for _ in range(3):
        ref = jnp.maximum(ref @ w2.T + b2, 0.0)
    ref = ref @ w3.T + b3

    # bf16 MXU operands with f32 accumulation
    assert jnp.allclose(out, ref, atol=5e-2, rtol=5e-2), "mismatch vs reference"

    print("KERNEL_OK")
</pallas_src>

<mosaic_0001>
module attributes {stable_mosaic.version = 11 : i64} {
  func.func @annnet_kernel(%arg0: i32, %arg1: memref<16x16xf32, #tpu.memory_space<vmem>>, %arg2: memref<16x128xbf16, #tpu.memory_space<vmem>>, %arg3: memref<1x128xf32, #tpu.memory_space<vmem>>, %arg4: memref<128x128xbf16, #tpu.memory_space<vmem>>, %arg5: memref<1x128xf32, #tpu.memory_space<vmem>>, %arg6: memref<128x128xbf16, #tpu.memory_space<vmem>>, %arg7: memref<1x128xf32, #tpu.memory_space<vmem>>, %arg8: memref<16x128xf32, #tpu.memory_space<vmem>>) attributes {dimension_semantics = [#tpu.dimension_semantics<parallel>], iteration_bounds = array<i64: 1>, scalar_prefetch = 0 : i64, scratch_operands = 0 : i64, tpu.core_type = #tpu.core_type<tc>, window_params = [{transform_indices = @transform_0, window_bounds = array<i64: 16, 16>}, {pipeline_mode = #tpu.pipeline_mode<synchronous>, transform_indices = @transform_1, window_bounds = array<i64: 16, 128>}, {pipeline_mode = #tpu.pipeline_mode<synchronous>, transform_indices = @transform_2, window_bounds = array<i64: 1, 128>}, {pipeline_mode = #tpu.pipeline_mode<synchronous>, transform_indices = @transform_3, window_bounds = array<i64: 128, 128>}, {pipeline_mode = #tpu.pipeline_mode<synchronous>, transform_indices = @transform_4, window_bounds = array<i64: 1, 128>}, {pipeline_mode = #tpu.pipeline_mode<synchronous>, transform_indices = @transform_5, window_bounds = array<i64: 128, 128>}, {pipeline_mode = #tpu.pipeline_mode<synchronous>, transform_indices = @transform_6, window_bounds = array<i64: 1, 128>}, {transform_indices = @transform_7, window_bounds = array<i64: 16, 128>}]} {
    %c0 = arith.constant 0 : index
    %c0_0 = arith.constant 0 : index
    %0 = vector.load %arg1[%c0, %c0_0] : memref<16x16xf32, #tpu.memory_space<vmem>>, vector<16x16xf32>
    %1 = arith.truncf %0 : vector<16x16xf32> to vector<16x16xbf16>
    %c0_1 = arith.constant 0 : index
    %c0_2 = arith.constant 0 : index
    %2 = vector.load %arg2[%c0_1, %c0_2] : memref<16x128xbf16, #tpu.memory_space<vmem>>, vector<16x128xbf16>
    %c0_3 = arith.constant 0 : index
    %c0_4 = arith.constant 0 : index
    %3 = vector.load %arg4[%c0_3, %c0_4] : memref<128x128xbf16, #tpu.memory_space<vmem>>, vector<128x128xbf16>
    %c0_5 = arith.constant 0 : index
    %c0_6 = arith.constant 0 : index
    %4 = vector.load %arg6[%c0_5, %c0_6] : memref<128x128xbf16, #tpu.memory_space<vmem>>, vector<128x128xbf16>
    %c0_7 = arith.constant 0 : index
    %c0_8 = arith.constant 0 : index
    %5 = vector.load %arg3[%c0_7, %c0_8] : memref<1x128xf32, #tpu.memory_space<vmem>>, vector<1x128xf32>
    %c0_9 = arith.constant 0 : index
    %c0_10 = arith.constant 0 : index
    %6 = vector.load %arg7[%c0_9, %c0_10] : memref<1x128xf32, #tpu.memory_space<vmem>>, vector<1x128xf32>
    %c0_11 = arith.constant 0 : index
    %c0_12 = arith.constant 0 : index
    %7 = vector.load %arg5[%c0_11, %c0_12] : memref<1x128xf32, #tpu.memory_space<vmem>>, vector<1x128xf32>
    %8 = vector.shape_cast %7 : vector<1x128xf32> to vector<1x128xf32>
    %9 = vector.broadcast %8 : vector<1x128xf32> to vector<16x128xf32>
    %cst = arith.constant dense<0.000000e+00> : vector<16x128xf32>
    %10 = tpu.matmul %1, %2, %cst {dimension_numbers = #tpu.dot_dimension_numbers<[1], [0], [0], [1], [0, 0, 1, 1], [], []>} : vector<16x16xbf16>, vector<16x128xbf16>, vector<16x128xf32> -> vector<16x128xf32>
    %11 = vector.broadcast %5 : vector<1x128xf32> to vector<16x128xf32>
    %12 = arith.addf %10, %11 : vector<16x128xf32>
    %cst_13 = arith.constant 0.000000e+00 : f32
    %13 = vector.broadcast %cst_13 : f32 to vector<16x128xf32>
    %14 = arith.maximumf %12, %13 : vector<16x128xf32>
    %15 = arith.truncf %14 : vector<16x128xf32> to vector<16x128xbf16>
    %cst_14 = arith.constant dense<0.000000e+00> : vector<16x128xf32>
    %16 = tpu.matmul %15, %3, %cst_14 {dimension_numbers = #tpu.dot_dimension_numbers<[1], [0], [0], [1], [0, 0, 1, 1], [], []>} : vector<16x128xbf16>, vector<128x128xbf16>, vector<16x128xf32> -> vector<16x128xf32>
    %17 = arith.addf %16, %9 : vector<16x128xf32>
    %cst_15 = arith.constant 0.000000e+00 : f32
    %18 = vector.broadcast %cst_15 : f32 to vector<16x128xf32>
    %19 = arith.maximumf %17, %18 : vector<16x128xf32>
    %20 = arith.truncf %19 : vector<16x128xf32> to vector<16x128xbf16>
    %cst_16 = arith.constant dense<0.000000e+00> : vector<16x128xf32>
    %21 = tpu.matmul %20, %3, %cst_16 {dimension_numbers = #tpu.dot_dimension_numbers<[1], [0], [0], [1], [0, 0, 1, 1], [], []>} : vector<16x128xbf16>, vector<128x128xbf16>, vector<16x128xf32> -> vector<16x128xf32>
    %22 = arith.addf %21, %9 : vector<16x128xf32>
    %cst_17 = arith.constant 0.000000e+00 : f32
    %23 = vector.broadcast %cst_17 : f32 to vector<16x128xf32>
    %24 = arith.maximumf %22, %23 : vector<16x128xf32>
    %25 = arith.truncf %24 : vector<16x128xf32> to vector<16x128xbf16>
    %cst_18 = arith.constant dense<0.000000e+00> : vector<16x128xf32>
    %26 = tpu.matmul %25, %3, %cst_18 {dimension_numbers = #tpu.dot_dimension_numbers<[1], [0], [0], [1], [0, 0, 1, 1], [], []>} : vector<16x128xbf16>, vector<128x128xbf16>, vector<16x128xf32> -> vector<16x128xf32>
    %27 = arith.addf %26, %9 : vector<16x128xf32>
    %cst_19 = arith.constant 0.000000e+00 : f32
    %28 = vector.broadcast %cst_19 : f32 to vector<16x128xf32>
    %29 = arith.maximumf %27, %28 : vector<16x128xf32>
    %30 = arith.truncf %29 : vector<16x128xf32> to vector<16x128xbf16>
    %cst_20 = arith.constant dense<0.000000e+00> : vector<16x128xf32>
    %31 = tpu.matmul %30, %4, %cst_20 {dimension_numbers = #tpu.dot_dimension_numbers<[1], [0], [0], [1], [0, 0, 1, 1], [], []>} : vector<16x128xbf16>, vector<128x128xbf16>, vector<16x128xf32> -> vector<16x128xf32>
    %32 = vector.broadcast %6 : vector<1x128xf32> to vector<16x128xf32>
    %33 = arith.addf %31, %32 : vector<16x128xf32>
    %c0_21 = arith.constant 0 : index
    %c0_22 = arith.constant 0 : index
    %34 = vector.load %arg8[%c0_21, %c0_22] : memref<16x128xf32, #tpu.memory_space<vmem>>, vector<16x128xf32>
    tpu.vector_store %arg8[%c0_21, %c0_22], %33 {strides = array<i32>} : memref<16x128xf32, #tpu.memory_space<vmem>>, vector<16x128xf32>,
    return
  }
  func.func @transform_0(%arg0: i32) -> (i32, i32) {
    %c0_i32 = arith.constant 0 : i32
    %c0_i32_0 = arith.constant 0 : i32
    return %arg0, %c0_i32 : i32, i32
  }
  func.func @transform_1(%arg0: i32) -> (i32, i32) {
    %c0_i32 = arith.constant 0 : i32
    %c0_i32_0 = arith.constant 0 : i32
    %c0_i32_1 = arith.constant 0 : i32
    return %c0_i32, %c0_i32_0 : i32, i32
  }
  func.func @transform_2(%arg0: i32) -> (i32, i32) {
    %c0_i32 = arith.constant 0 : i32
    %c0_i32_0 = arith.constant 0 : i32
    %c0_i32_1 = arith.constant 0 : i32
    return %c0_i32, %c0_i32_0 : i32, i32
  }
  func.func @transform_3(%arg0: i32) -> (i32, i32) {
    %c0_i32 = arith.constant 0 : i32
    %c0_i32_0 = arith.constant 0 : i32
    %c0_i32_1 = arith.constant 0 : i32
    return %c0_i32, %c0_i32_0 : i32, i32
  }
  func.func @transform_4(%arg0: i32) -> (i32, i32) {
    %c0_i32 = arith.constant 0 : i32
    %c0_i32_0 = arith.constant 0 : i32
    %c0_i32_1 = arith.constant 0 : i32
    return %c0_i32, %c0_i32_0 : i32, i32
  }
  func.func @transform_5(%arg0: i32) -> (i32, i32) {
    %c0_i32 = arith.constant 0 : i32
    %c0_i32_0 = arith.constant 0 : i32
    %c0_i32_1 = arith.constant 0 : i32
    return %c0_i32, %c0_i32_0 : i32, i32
  }
  func.func @transform_6(%arg0: i32) -> (i32, i32) {
    %c0_i32 = arith.constant 0 : i32
    %c0_i32_0 = arith.constant 0 : i32
    %c0_i32_1 = arith.constant 0 : i32
    return %c0_i32, %c0_i32_0 : i32, i32
  }
  func.func @transform_7(%arg0: i32) -> (i32, i32) {
    %c0_i32 = arith.constant 0 : i32
    %c0_i32_0 = arith.constant 0 : i32
    return %arg0, %c0_i32 : i32, i32
  }
}

</mosaic_0001>

<bundles_post_ra>
// kernel: annnet_forward.1
= control target key start
LH: loop header
LB: loop body
LE: loop exit
PB: predicated region body
PF: predicated region fallthrough
CT: control target
= control target key end

     0   :  { %12 = vsyncpa [#allocation3], 0  ;;  %s523_s0 = inlined_call_operand.vmem [shape: f32[16,16], index: 0, kind: input, shape index: {}]   ;;  %s524_s1 = inlined_call_operand.vmem [shape: bf16[16,128], index: 1, kind: input, shape index: {}]   ;;  %s525_s2 = inlined_call_operand.vmem [shape: f32[1,128], index: 2, kind: input, shape index: {}]   ;;  %s526_s3 = inlined_call_operand.hbm [shape: bf16[128,128], index: 3, kind: input, shape index: {}]   ;;  %s527_s4 = inlined_call_operand.vmem [shape: f32[1,128], index: 4, kind: input, shape index: {}]   ;;  %s528_s5 = inlined_call_operand.hbm [shape: bf16[128,128], index: 5, kind: input, shape index: {}]   ;;  %s529_s6 = inlined_call_operand.vmem [shape: f32[1,128], index: 6, kind: input, shape index: {}]   ;;  %s530_s7 = inlined_call_operand.vmem [shape: f32[16,128], index: 7, kind: output, shape index: {}]  }
   0x1   :  { %s24_s26 = sshll.u32 %s526_s3, 4  ;;  %s25_s26 = int_to_ptr.hbm [resolvable:$true] %s24_s26 }
   0x2   :  { %13 = vsyncpa [#allocation5], 0  ;;  %s449_s27 = smov [#allocation2]   ;;  %s39_s8 = sshll.u32 %s528_s5, 4  ;;  %s40_s8 = int_to_ptr.hbm [resolvable:$true] %s39_s8 }
   0x3   :  { %s26_s28 = sshll.u32 %s449_s27, 4  ;;  %s450_s9 = smov 64   ;;  %s27_s28 = int_to_ptr.vmem [resolvable:$true] %s26_s28 }
   0x4   :  { %s451_s10 = smov 4   ;;  %s452_s11 = smov [#allocation4]  }
   0x5   :  { %32 = dma.hbm_to_vmem [thread:$0]  %s25_s26, 1024, %s27_s28, [#allocation3], %s450_s9, %s450_s9, %s451_s10  }
   0x6   :  { %s41_s12 = sshll.u32 %s452_s11, 4  ;;  %s42_s12 = int_to_ptr.vmem [resolvable:$true] %s41_s12 }
   0x7   :  { %47 = dma.hbm_to_vmem [thread:$0]  %s40_s8, 1024, %s42_s12, [#allocation5], %s450_s9, %s450_s9, %s451_s10  }
   0x8   :  { %445 = dma.done.wait [#allocation3], 1024  }
   0x9   :  { %446 = vsyncadd [#allocation3], 4294966272 }
   0xa   :  { %447 = dma.done.wait [#allocation5], 1024  }
   0xb   :  { %448 = vsyncadd [#allocation5], 4294966272  ;;  %v373_v0 = vld [vmem:[%s524_s1] sm:$0xff]  ;;  %v60_v2 = vld [vmem:[%s523_s0 + $0x8] sm:$0xff]  ;;  %vm111_vm0 = vcmask 130048  }
   0xc   :  { %v59_v1 = vld [vmem:[%s523_s0] sm:$0xff]  ;;  %v381_v4 = vld [vmem:[#allocation2 + $0x38] sm:$0xff]  ;;  %122 = vmatpush.bf16.msra.mxu0 %v373_v0  ;;  %v380_v5 = vld [vmem:[#allocation2 + $0x30] sm:$0xff] }
   0xd   :  { %v61_v3 = vpack.c.bf16 %v60_v2, %v59_v1  ;;  %180 = vmatpush.bf16.msra.mxu1 %v381_v4  ;;  %197 = vmatpush.bf16.msra.mxu2 %v381_v4  ;;  %v379_v6 = vld [vmem:[#allocation2 + $0x28] sm:$0xff]  ;;  %v378_v7 = vld [vmem:[#allocation2 + $0x20] sm:$0xff]  ;;  %v377_v8 = vld [vmem:[#allocation2 + $0x18] sm:$0xff] }
   0xe   :  { %214 = vmatpush.bf16.msra.mxu3 %v381_v4  ;;  %v376_v9 = vld [vmem:[#allocation2 + $0x10] sm:$0xff]  ;;  %v375_v10 = vld [vmem:[#allocation2 + $0x8] sm:$0xff]  ;;  %v374_v11 = vld [vmem:[#allocation2] sm:$0xff] }
   0xf   :  { %308 = vmatmul.msk.bf16.vlgmr.msra.gmra.mxu0 %vm111_vm0, %v61_v3  ;;  %v394_v13 = vld [vmem:[%s525_s2] ss:$0 sm:$0xff]  ;;  %v389_v28 = vld [vmem:[#allocation4 + $0x38] sm:$0xff]  ;;  %v388_v29 = vld [vmem:[#allocation4 + $0x30] sm:$0xff] }
  0x10   :  { %v395_v21 = vld [vmem:[%s527_s4] ss:$0 sm:$0xff]  ;;  %282 = vmatpush.bf16.msrb.mxu0 %v389_v28  ;;  %v387_v30 = vld [vmem:[#allocation4 + $0x28] sm:$0xff]  ;;  %v385_v39 = vld [vmem:[#allocation4 + $0x18] sm:$0xff] }
  0x11   :  { %181 = vmatpush.bf16.msra.mxu1 %v380_v5  ;;  %198 = vmatpush.bf16.msra.mxu2 %v380_v5  ;;  %v386_v31 = vld [vmem:[#allocation4 + $0x20] sm:$0xff]  ;;  %v384_v40 = vld [vmem:[#allocation4 + $0x10] sm:$0xff]  ;;  %v383_v41 = vld [vmem:[#allocation4 + $0x8] sm:$0xff] }
  0x12   :  { %215 = vmatpush.bf16.msra.mxu3 %v380_v5  ;;  %v382_v42 = vld [vmem:[#allocation4] sm:$0xff] }
  0x13   :  { %v396_v50 = vld [vmem:[%s529_s6] ss:$0 sm:$0xff] }
  0x14   :  { %283 = vmatpush.bf16.msrb.mxu0 %v388_v29 }
  0x15   :  { %182 = vmatpush.bf16.msra.mxu1 %v379_v6  ;;  %199 = vmatpush.bf16.msra.mxu2 %v379_v6 }
  0x16   :  { %216 = vmatpush.bf16.msra.mxu3 %v379_v6 }
  0x18   :  { %284 = vmatpush.bf16.msrb.mxu0 %v387_v30 }
  0x19   :  { %183 = vmatpush.bf16.msra.mxu1 %v378_v7  ;;  %200 = vmatpush.bf16.msra.mxu2 %v378_v7 }
  0x1a   :  { %217 = vmatpush.bf16.msra.mxu3 %v378_v7 }
  0x1c   :  { %285 = vmatpush.bf16.msrb.mxu0 %v386_v31 }
  0x1d   :  { %184 = vmatpush.bf16.msra.mxu1 %v377_v8  ;;  %201 = vmatpush.bf16.msra.mxu2 %v377_v8 }
  0x1e   :  { %218 = vmatpush.bf16.msra.mxu3 %v377_v8 }
  0x20   :  { %286 = vmatpush.bf16.msrb.mxu0 %v385_v39 }
  0x21   :  { %185 = vmatpush.bf16.msra.mxu1 %v376_v9  ;;  %202 = vmatpush.bf16.msra.mxu2 %v376_v9 }
  0x22   :  { %219 = vmatpush.bf16.msra.mxu3 %v376_v9 }
  0x24   :  { %287 = vmatpush.bf16.msrb.mxu0 %v384_v40 }
  0x25   :  { %186 = vmatpush.bf16.msra.mxu1 %v375_v10  ;;  %203 = vmatpush.bf16.msra.mxu2 %v375_v10 }
  0x26   :  { %220 = vmatpush.bf16.msra.mxu3 %v375_v10 }
  0x28   :  { %288 = vmatpush.bf16.msrb.mxu0 %v383_v41 }
  0x29   :  { %187 = vmatpush.bf16.msra.mxu1 %v374_v11  ;;  %204 = vmatpush.bf16.msra.mxu2 %v374_v11 }
  0x2a   :  { %221 = vmatpush.bf16.msra.mxu3 %v374_v11 }
  0x2c   :  { %289 = vmatpush.bf16.msrb.mxu0 %v382_v42 }
  0x8c   :  { %v124_v12 = vpop.f32.mrf.mxu0 }
  0x8d   :  { %v125_v14 = vadd.f32 %v394_v13, %v124_v12 }
  0x8f   :  { %v129_v17 = vmax.f32 %v125_v14, 0.0 }
  0x94   :  { %v126_v15 = vpop.f32.mrf.mxu0 }
  0x95   :  { %v127_v16 = vadd.f32 %v394_v13, %v126_v15 }
  0x97   :  { %v130_v18 = vmax.f32 %v127_v16, 0.0 }
  0x99   :  { %v131_v19 = vpack.c.bf16 %v130_v18, %v129_v17 }
  0x9b   :  { %188 = vmatmul.bf16.vlgmr.msra.gmra.mxu1 %v131_v19 }
 0x118   :  { %v189_v20 = vpop.f32.mrf.mxu1 }
 0x119   :  { %v190_v22 = vadd.f32 %v395_v21, %v189_v20 }
 0x11b   :  { %v194_v25 = vmax.f32 %v190_v22, 0.0 }
 0x120   :  { %v191_v23 = vpop.f32.mrf.mxu1 }
 0x121   :  { %v192_v24 = vadd.f32 %v395_v21, %v191_v23 }
 0x123   :  { %v195_v26 = vmax.f32 %v192_v24, 0.0 }
 0x125   :  { %v196_v27 = vpack.c.bf16 %v195_v26, %v194_v25 }
 0x127   :  { %205 = vmatmul.bf16.vlgmr.msra.gmra.mxu2 %v196_v27 }
 0x1aa   :  { %v206_v32 = vpop.f32.mrf.mxu2 }
 0x1ab   :  { %v207_v33 = vadd.f32 %v395_v21, %v206_v32 }
 0x1ad   :  { %v211_v36 = vmax.f32 %v207_v33, 0.0 }
 0x1b2   :  { %v208_v34 = vpop.f32.mrf.mxu2 }
 0x1b3   :  { %v209_v35 = vadd.f32 %v395_v21, %v208_v34 }
 0x1b5   :  { %v212_v37 = vmax.f32 %v209_v35, 0.0 }
 0x1b7   :  { %v213_v38 = vpack.c.bf16 %v212_v37, %v211_v36 }
 0x1b9   :  { %222 = vmatmul.bf16.vlgmr.msra.gmra.mxu3 %v213_v38 }
 0x23c   :  { %v223_v43 = vpop.f32.mrf.mxu3 }
 0x23d   :  { %v224_v44 = vadd.f32 %v395_v21, %v223_v43 }
 0x23f   :  { %v228_v47 = vmax.f32 %v224_v44, 0.0 }
 0x244   :  { %v225_v45 = vpop.f32.mrf.mxu3 }
 0x245   :  { %v226_v46 = vadd.f32 %v395_v21, %v225_v45 }
 0x247   :  { %v229_v48 = vmax.f32 %v226_v46, 0.0 }
 0x249   :  { %v230_v49 = vpack.c.bf16 %v229_v48, %v228_v47 }
 0x24b   :  { %290 = vmatmul.bf16.vlgmr.msrb.gmra.mxu0 %v230_v49 }
 0x2c8   :  { %v291_v51 = vpop.f32.mrf.mxu0 }
 0x2c9   :  { %v292_v52 = vadd.f32 %v396_v50, %v291_v51 }
 0x2cb   :  { %296 = vst [vmem:[%s530_s7] sm:$0xff] %v292_v52 }
 0x2d0   :  { %v293_v53 = vpop.f32.mrf.mxu0 }
 0x2d1   :  { %v294_v54 = vadd.f32 %v396_v50, %v293_v53 }
 0x2d3   :  { %297 = vst [vmem:[%s530_s7 + $0x8] sm:$0xff] %v294_v54 }
 0x2d4   :  { %302 = vsyncpa [#allocation3], 1 }
 0x2d5   :  { %303 = vsyncpa [#allocation5], 1 }

</bundles_post_ra>
